<compile_context>
chip_gen: v6e
topology: v6e:2x2x1
jax: 0.10.0
libtpu: 0.0.40
codegen_flags: <defaults>
</compile_context>

<pallas_src>
import functools

import jax
import jax.numpy as jnp
from jax.experimental import pallas as pl
from jax.experimental.pallas import tpu as pltpu


# --------------------------------------------------------------------------
# Kernels
# --------------------------------------------------------------------------
def _l2_normalize_kernel(x_ref, o_ref):
    # Fast path for power == 2: VPU square + lane reduce + EUP rsqrt + multiply.
    x = x_ref[...]
    xf = x.astype(jnp.float32)
    ss = jnp.sum(xf * xf, axis=-1, keepdims=True)     # f32 accumulation
    inv = jax.lax.rsqrt(ss)                           # (tile_n, 1), EUP
    # Final scale in the input dtype (bf16 multiply on v6e/v7x; no full-tile
    # f32 output temporary).  For f32 inputs this is the plain f32 path.
    o_ref[...] = (x * inv.astype(x.dtype)).astype(o_ref.dtype)


def _lp_normalize_kernel(power, x_ref, o_ref):
    # Generic p: x.pow(p).sum(-1).pow(1/p); out = x / norm  ==  x * s**(-1/p).
    x = x_ref[...]
    xf = x.astype(jnp.float32)
    if float(power) == int(power):
        xp = xf ** int(power)                 # lax.integer_pow -> VPU multiplies
    else:
        xp = xf ** jnp.float32(power)         # NaN for negative x, as in torch
    s = jnp.sum(xp, axis=-1, keepdims=True)   # (tile_n, 1) f32
    inv = s ** jnp.float32(-1.0 / float(power))  # per-row pow only, no tile divide
    o_ref[...] = (x * inv.astype(x.dtype)).astype(o_ref.dtype)


# --------------------------------------------------------------------------
# Wrapper
# --------------------------------------------------------------------------
def _round_up(a, b):
    return ((a + b - 1) // b) * b


def _tpu_vmem_and_cores():
    """Best-effort query of per-TensorCore VMEM capacity and TC count."""
    vmem_bytes = None
    try:
        info = pltpu.get_tpu_info()
        vmem_bytes = getattr(info, "vmem_capacity_bytes", None)
    except Exception:
        pass
    kind = ""
    try:
        kind = jax.devices()[0].device_kind.lower()
    except Exception:
        pass
    is_v7 = ("v7" in kind) or ("tpu7" in kind)
    num_tc = 2 if is_v7 else 1
    if vmem_bytes is None:
        vmem_bytes = (64 << 20) if is_v7 else (128 << 20)
    return int(vmem_bytes), num_tc


def normalize(x, power=2):
    """Lp-normalize each row of a (N, D) array along D (== PyTorch dim=1).

    Matches `x.pow(p).sum(1, keepdim=True).pow(1/p)` + `x.div(norm)` exactly,
    including NaNs for all-zero rows and for negative bases with fractional p.
    """
    N, D = x.shape
    dtype = x.dtype
    itemsize = jnp.dtype(dtype).itemsize

    # Minimum sublane packing tile per dtype width (f32: 8, bf16: 16, int8/fp8: 32).
    sub = {4: 8, 2: 16, 1: 32}.get(itemsize, 8)

    # Generation-aware VMEM sizing.
    vmem_bytes, num_tc = _tpu_vmem_and_cores()
    if vmem_bytes <= (64 << 20):            # v7x-class: 64 MiB per TC
        vmem_budget, vmem_limit = 26 << 20, 44 << 20
    else:                                    # v5e / v6e: 128 MiB per TC
        vmem_budget, vmem_limit = 56 << 20, 96 << 20

    # Per-row VMEM footprint: double-buffered (in + out) blocks in `dtype`
    # plus ~3 full-tile f32 temporaries (f32 upcast + op temps).  The lane axis
    # is padded to 128 inside VMEM regardless of D, so count the padded width.
    D_lane = _round_up(D, 128)
    bytes_per_row = D_lane * (4 * itemsize + 12)

    tile_n = min(8192, max(1, vmem_budget // bytes_per_row))
    tile_n = max(sub, (tile_n // sub) * sub)
    tile_n = min(tile_n, _round_up(N, sub))
    # TODO(synk): for extremely large D where even a `sub`-row slab overflows
    # VMEM, add a second grid axis over D with a VMEM accumulator (two-pass).

    grid_n = pl.cdiv(N, tile_n)
    # v7x only: if everything fits in one tile, split it so both TensorCores
    # get work on the "parallel" axis (no-op on single-TC v5e/v6e).
    if num_tc >= 2 and grid_n == 1 and N > sub:
        tile_n = max(sub, _round_up(pl.cdiv(N, num_tc), sub))
        grid_n = pl.cdiv(N, tile_n)

    if power == 2:
        kernel = _l2_normalize_kernel
    else:
        kernel = functools.partial(_lp_normalize_kernel, power)

    # Block last dim == full D (legal even when D % 128 != 0); ragged N handled
    # by the grid's partial last block (out-of-bounds rows are never written
    # back), so there is no wrapper pad / slice and no extra HBM pass.
    return pl.pallas_call(
        kernel,
        out_shape=jax.ShapeDtypeStruct((N, D), dtype),
        grid_spec=pltpu.PrefetchScalarGridSpec(
            num_scalar_prefetch=0,
            grid=(grid_n,),
            in_specs=[pl.BlockSpec((tile_n, D), lambda i: (i, 0))],
            out_specs=pl.BlockSpec((tile_n, D), lambda i: (i, 0)),
        ),
        compiler_params=pltpu.CompilerParams(
            dimension_semantics=("parallel",),
            vmem_limit_bytes=vmem_limit,
        ),
    )(x)


# --------------------------------------------------------------------------
# Self-test
# --------------------------------------------------------------------------
if __name__ == "__main__":
    key = jax.random.PRNGKey(0)

    # (batch, features) as the module's forward implies; dim=1 == last dim here.
    N, D = 8, 32
    x = jax.random.normal(key, (N, D), dtype=jnp.float32)
    out = jax.block_until_ready(normalize(x, power=2))
    ref = x / jnp.sqrt(jnp.sum(x * x, axis=1, keepdims=True))
    assert out.shape == x.shape and out.dtype == x.dtype
    assert jnp.allclose(out, ref, atol=1e-5, rtol=1e-4)

    # Ragged / non-128-aligned shape: exercises the partial-last-block path
    # (no wrapper padding, no output slice).
    x2 = jax.random.normal(jax.random.PRNGKey(1), (10, 48), dtype=jnp.float32)
    out2 = jax.block_until_ready(normalize(x2, power=2))
    ref2 = x2 / jnp.sqrt(jnp.sum(x2 * x2, axis=1, keepdims=True))
    assert out2.shape == x2.shape
    assert jnp.allclose(out2, ref2, atol=1e-5, rtol=1e-4)

    # bf16 input: f32 accumulation, bf16 final scale.
    x3 = jax.random.normal(jax.random.PRNGKey(2), (16, 96), dtype=jnp.bfloat16)
    out3 = jax.block_until_ready(normalize(x3, power=2))
    x3f = x3.astype(jnp.float32)
    ref3 = x3f / jnp.sqrt(jnp.sum(x3f * x3f, axis=1, keepdims=True))
    assert out3.shape == x3.shape and out3.dtype == x3.dtype
    assert jnp.allclose(out3.astype(jnp.float32), ref3, atol=2e-2, rtol=2e-2)

    # Generic (even integer) Lp path: pow via repeated multiplies, s**(-1/p).
    x4 = jax.random.normal(jax.random.PRNGKey(3), (8, 32), dtype=jnp.float32)
    out4 = jax.block_until_ready(normalize(x4, power=4))
    ref4 = x4 / (jnp.sum(x4 ** 4, axis=1, keepdims=True) ** 0.25)
    assert jnp.allclose(out4, ref4, atol=1e-5, rtol=1e-4)

    print("KERNEL_OK")
</pallas_src>

<mosaic_0001>
module attributes {stable_mosaic.version = 11 : i64} {
  func.func @_l2_normalize_kernel(%arg0: i32, %arg1: memref<8x32xf32, #tpu.memory_space<vmem>>, %arg2: memref<8x32xf32, #tpu.memory_space<vmem>>) attributes {dimension_semantics = [#tpu.dimension_semantics<parallel>], iteration_bounds = array<i64: 1>, scalar_prefetch = 0 : i64, scratch_operands = 0 : i64, tpu.core_type = #tpu.core_type<tc>, window_params = [{transform_indices = @transform_0, window_bounds = array<i64: 8, 32>}, {transform_indices = @transform_1, window_bounds = array<i64: 8, 32>}]} {
    %c0 = arith.constant 0 : index
    %c0_0 = arith.constant 0 : index
    %0 = vector.load %arg1[%c0, %c0_0] : memref<8x32xf32, #tpu.memory_space<vmem>>, vector<8x32xf32>
    %1 = arith.mulf %0, %0 : vector<8x32xf32>
    %cst = arith.constant dense<0.000000e+00> : vector<8xf32>
    %2 = vector.multi_reduction <add>, %1, %cst [1] : vector<8x32xf32> to vector<8xf32>
    %3 = vector.shape_cast %2 : vector<8xf32> to vector<8x1xf32>
    %4 = math.rsqrt %3 : vector<8x1xf32>
    %5 = vector.broadcast %4 : vector<8x1xf32> to vector<8x32xf32>
    %6 = arith.mulf %0, %5 : vector<8x32xf32>
    %c0_1 = arith.constant 0 : index
    %c0_2 = arith.constant 0 : index
    %7 = vector.load %arg2[%c0_1, %c0_2] : memref<8x32xf32, #tpu.memory_space<vmem>>, vector<8x32xf32>
    tpu.vector_store %arg2[%c0_1, %c0_2], %6 {strides = array<i32>} : memref<8x32xf32, #tpu.memory_space<vmem>>, vector<8x32xf32>,
    return
  }
  func.func @transform_0(%arg0: i32) -> (i32, i32) {
    %c0_i32 = arith.constant 0 : i32
    %c0_i32_0 = arith.constant 0 : i32
    return %arg0, %c0_i32 : i32, i32
  }
  func.func @transform_1(%arg0: i32) -> (i32, i32) {
    %c0_i32 = arith.constant 0 : i32
    %c0_i32_0 = arith.constant 0 : i32
    return %arg0, %c0_i32 : i32, i32
  }
}

</mosaic_0001>

<bundles_post_ra>
// kernel: tpu_custom_call.1
= control target key start
LH: loop header
LB: loop body
LE: loop exit
PB: predicated region body
PF: predicated region fallthrough
CT: control target
= control target key end

     0   :  { %6 = vsyncpa [#allocation3], 0  ;;  %s111_s0 = inlined_call_operand.hbm [shape: f32[8,32], index: 0, kind: input, shape index: {}]   ;;  %s112_s1 = inlined_call_operand.hbm [shape: f32[8,32], index: 1, kind: output, shape index: {}]  }
   0x1   :  { %7 = vsyncpa [#allocation4], 0  ;;  %s93_s6 = smov [#allocation2]  }
   0x2   :  { %s14_s7 = sshll.u32 %s93_s6, 4  ;;  %s15_s7 = int_to_ptr.vmem [resolvable:$true] %s14_s7 }
   0x3   :  { %s57_s8 = scalar_lea.vmem %s15_s7, 128  ;;  %p62_p1 = scmp.lt.s32.totalorder %s15_s7, %s15_s7 }
   0x4   :  { %p58_p0 = scmp.ne.s32.totalorder %s15_s7, %s57_s8  ;;  %p63_p2 = scmp.lt.s32.totalorder %s57_s8, %s57_s8 }
   0x6   :  { %p64_p3 = por %p63_p2, %p62_p1 }
   0x8   :  { %p65_p4 = pnand %p64_p3, %p58_p0 }
   0xa   :  { %68 = shalt.err (!%p65_p4)
}
   0xb   :  { %17 = dma.hbm_to_vmem [thread:$0]  %s111_s0, 128, %s15_s7, [#allocation3]  }
   0xc   :  { %89 = dma.done.wait [#allocation3], 128  }
   0xd   :  { %90 = vsyncadd [#allocation3], 4294967168  ;;  %v21_v0 = vld [vmem:[#allocation2] sm:$0xff]  ;;  %vm23_vm0 = vcmask 261120   ;;  %s94_s11 = smov [#allocation5]  }
   0xe   :  { %v22_v1 = vmul.f32 %v21_v0, %v21_v0  ;;  %s36_s12 = sshll.u32 %s94_s11, 4  ;;  %s37_s12 = int_to_ptr.vmem [resolvable:$true] %s36_s12 }
   0xf   :  { %s69_s13 = scalar_lea.vmem %s37_s12, 128  ;;  %p74_p6 = scmp.lt.s32.totalorder %s37_s12, %s37_s12 }
  0x10   :  { %v24_v2 = vsel %vm23_vm0, %v22_v1, 0.0  ;;  %p70_p5 = scmp.ne.s32.totalorder %s37_s12, %s69_s13  ;;  %p75_p7 = scmp.lt.s32.totalorder %s69_s13, %s69_s13 }
  0x11   :  { %25 = vadd.xlane.f32.xlu0 %v24_v2 }
  0x12   :  { %p76_p8 = por %p75_p7, %p74_p6 }
  0x14   :  { %p77_p9 = pnand %p76_p8, %p70_p5 }
  0x9a   :  { %v26_v3 = vpop.xlane.xlu0 %25 }
  0x9b   :  { %47 = vrsqrt.f32 %v26_v3 }
  0xa8   :  { %v48_v4 = vpop.eup %47 }
  0xa9   :  { %v28_v5 = vmul.f32 %v48_v4, %v21_v0 }
  0xab   :  { %29 = vst.msk [vmem:[#allocation5] sm:$0xff] %vm23_vm0, %v28_v5 }
  0xac   :  { %80 = shalt.err (!%p77_p9)
}
  0xad   :  { %39 = dma.vmem_to_hbm [thread:$0]  %s37_s12, 128, %s112_s1, [#allocation4]  }
  0xae   :  { %91 = dma.done.wait [#allocation4], 128  }
  0xaf   :  { %92 = vsyncadd [#allocation4], 4294967168 }
  0xb0   :  { %43 = vsyncpa [#allocation3], 1 }
  0xb1   :  { %44 = vsyncpa [#allocation4], 1 }

</bundles_post_ra>
